<compile_context>
chip_gen: v7x
topology: tpu7x:2x2x1
jax: 0.10.0
libtpu: 0.0.40
codegen_flags: <defaults>
</compile_context>

<pallas_src>
import jax
import jax.numpy as jnp
from jax.experimental import pallas as pl
from jax.experimental.pallas import tpu as pltpu

NUM_CLASSES = 17
D_IN, D_H1, D_H2 = 376, 100, 50

D_H_PAD = 128     # padded hidden width (50 -> 128), lane-dense
D_OUT_PAD = 128   # padded output width (17 -> 128), lane-dense (unmasked vst)


def _round_up(x, m):
    return (x + m - 1) // m * m


def mlp_kernel(x_ref, w12_ref, b12_ref, w3_ref, b3_ref, o_ref):
    """Fused (Linear1 o Linear2) -> tanh -> Linear3 -> tanh on one batch tile."""
    x = x_ref[...].astype(jnp.bfloat16)                                 # [TM, 376]
    h = jnp.dot(x, w12_ref[...], preferred_element_type=jnp.float32)    # MXU, f32 acc
    h = jnp.tanh(h + b12_ref[...])                                      # f32 epilogue
    y = jnp.dot(h.astype(jnp.bfloat16), w3_ref[...],
                preferred_element_type=jnp.float32)
    o_ref[...] = jnp.tanh(y + b3_ref[...]).astype(jnp.bfloat16)         # [TM, 128] bf16


def prepare_params(params):
    """Host-side: fuse linear1/linear2, zero-pad to aligned tiles, cast to bf16."""
    w1, b1, w2, b2, w3, b3 = params
    # No nonlinearity between linear1 and linear2 -> fuse algebraically.
    w12 = w1 @ w2                      # [376, 50] f32
    b12 = b1 @ w2 + b2                 # [1, 50]   f32

    w12_p = jnp.zeros((D_IN, D_H_PAD), jnp.float32).at[:, :D_H2].set(w12)
    b12_p = jnp.zeros((1, D_H_PAD), jnp.float32).at[:, :D_H2].set(b12)
    w3_p = jnp.zeros((D_H_PAD, D_OUT_PAD), jnp.float32).at[:D_H2, :NUM_CLASSES].set(w3)
    b3_p = jnp.zeros((1, D_OUT_PAD), jnp.float32).at[:, :NUM_CLASSES].set(b3)

    # Weights bf16 (halves HBM traffic), biases kept f32 for the f32 epilogue.
    return (w12_p.astype(jnp.bfloat16), b12_p,
            w3_p.astype(jnp.bfloat16), b3_p)


def nn_model_forward(x, fused_params, *, tm=2048):
    w12, b12, w3, b3 = fused_params
    B = x.shape[0]

    # Row tile: multiple of 8 (sublane), capped at ceil(B/2) so that at large B
    # the grid has >= 2 steps and the "parallel" axis can split across v7x's two
    # TensorCores.  Batch is NOT padded; the last tile may be ragged (excess
    # rows are garbage, finite after tanh, and sliced away below).
    TM = max(8, min(tm, _round_up(pl.cdiv(B, 2), 8)))
    grid = (pl.cdiv(B, TM),)

    flops = 2 * B * (D_IN * D_H_PAD + D_H_PAD * D_OUT_PAD)
    bytes_accessed = (x.size * 4                      # f32 input, read once by kernel
                      + w12.size * 2 + w3.size * 2    # bf16 weights
                      + (b12.size + b3.size) * 4      # f32 biases
                      + B * D_OUT_PAD * 2)            # bf16 output writeback

    out_pad = pl.pallas_call(
        mlp_kernel,
        out_shape=jax.ShapeDtypeStruct((B, D_OUT_PAD), jnp.bfloat16),
        grid=grid,
        in_specs=[
            pl.BlockSpec((TM, D_IN), lambda i: (i, 0)),              # x batch tile (f32)
            pl.BlockSpec((D_IN, D_H_PAD), lambda i: (0, 0)),         # W12 (VMEM-resident)
            pl.BlockSpec((1, D_H_PAD), lambda i: (0, 0)),            # b12
            pl.BlockSpec((D_H_PAD, D_OUT_PAD), lambda i: (0, 0)),    # W3  (VMEM-resident)
            pl.BlockSpec((1, D_OUT_PAD), lambda i: (0, 0)),          # b3
        ],
        out_specs=pl.BlockSpec((TM, D_OUT_PAD), lambda i: (i, 0)),   # lane-dense bf16 out
        compiler_params=pltpu.CompilerParams(
            dimension_semantics=("parallel",),   # megacore sharding on v7x; harmless elsewhere
            vmem_limit_bytes=32 << 20,
        ),
        cost_estimate=pl.CostEstimate(
            flops=flops,
            transcendentals=B * (D_H_PAD + D_OUT_PAD),
            bytes_accessed=bytes_accessed,
        ),
    )(x, w12, b12, w3, b3)

    # Slice the 17 valid columns and restore the module's f32 output dtype.
    return out_pad[:, :NUM_CLASSES].astype(jnp.float32)


def init_params(key):
    """Deterministic Linear params (uniform fan-in init, like torch defaults).
    Weights stored transposed as [in, out] vs torch's [out, in]."""
    def linear(k, d_in, d_out):
        kw, kb = jax.random.split(k)
        bound = 1.0 / jnp.sqrt(d_in)
        w = jax.random.uniform(kw, (d_in, d_out), jnp.float32, -bound, bound)
        b = jax.random.uniform(kb, (1, d_out), jnp.float32, -bound, bound)
        return w, b

    k1, k2, k3 = jax.random.split(key, 3)
    w1, b1 = linear(k1, D_IN, D_H1)
    w2, b2 = linear(k2, D_H1, D_H2)
    w3, b3 = linear(k3, D_H2, NUM_CLASSES)
    return (w1, b1, w2, b2, w3, b3)


def reference_forward(x, params):
    """Unfused f32 reference, identical to the PyTorch forward."""
    w1, b1, w2, b2, w3, b3 = params
    h1 = x @ w1 + b1
    h2 = jnp.tanh(h1 @ w2 + b2)
    return jnp.tanh(h2 @ w3 + b3)


if __name__ == "__main__":
    key = jax.random.PRNGKey(0)
    kx, kp = jax.random.split(key)

    B = 8
    x = jax.random.normal(kx, (B, D_IN), jnp.float32)
    params = init_params(kp)
    fused = prepare_params(params)

    out = jax.block_until_ready(nn_model_forward(x, fused))

    ref = reference_forward(x, params)
    assert out.shape == (B, NUM_CLASSES)
    assert out.dtype == jnp.float32
    # bf16 weights/activations + algebraic W1@W2 fusion + bf16 output store ->
    # matches the f32 reference at bf16 rounding level (tightening this breaks).
    assert jnp.allclose(out, ref, atol=2.5e-2, rtol=0.0), \
        f"max abs diff {jnp.max(jnp.abs(out - ref))}"

    print("KERNEL_OK")
</pallas_src>

<mosaic_0001>
module attributes {stable_mosaic.version = 11 : i64} {
  func.func @mlp_kernel(%arg0: i32, %arg1: memref<8x376xf32, #tpu.memory_space<vmem>>, %arg2: memref<376x128xbf16, #tpu.memory_space<vmem>>, %arg3: memref<1x128xf32, #tpu.memory_space<vmem>>, %arg4: memref<128x128xbf16, #tpu.memory_space<vmem>>, %arg5: memref<1x128xf32, #tpu.memory_space<vmem>>, %arg6: memref<8x128xbf16, #tpu.memory_space<vmem>>) attributes {dimension_semantics = [#tpu.dimension_semantics<parallel>], iteration_bounds = array<i64: 1>, scalar_prefetch = 0 : i64, scratch_operands = 0 : i64, tpu.core_type = #tpu.core_type<tc>, window_params = [{transform_indices = @transform_0, window_bounds = array<i64: 8, 376>}, {pipeline_mode = #tpu.pipeline_mode<synchronous>, transform_indices = @transform_1, window_bounds = array<i64: 376, 128>}, {pipeline_mode = #tpu.pipeline_mode<synchronous>, transform_indices = @transform_2, window_bounds = array<i64: 1, 128>}, {pipeline_mode = #tpu.pipeline_mode<synchronous>, transform_indices = @transform_3, window_bounds = array<i64: 128, 128>}, {pipeline_mode = #tpu.pipeline_mode<synchronous>, transform_indices = @transform_4, window_bounds = array<i64: 1, 128>}, {transform_indices = @transform_5, window_bounds = array<i64: 8, 128>}]} {
    %c0 = arith.constant 0 : index
    %c0_0 = arith.constant 0 : index
    %0 = vector.load %arg1[%c0, %c0_0] : memref<8x376xf32, #tpu.memory_space<vmem>>, vector<8x376xf32>
    %1 = arith.truncf %0 : vector<8x376xf32> to vector<8x376xbf16>
    %c0_1 = arith.constant 0 : index
    %c0_2 = arith.constant 0 : index
    %2 = vector.load %arg2[%c0_1, %c0_2] : memref<376x128xbf16, #tpu.memory_space<vmem>>, vector<376x128xbf16>
    %cst = arith.constant dense<0.000000e+00> : vector<8x128xf32>
    %3 = tpu.matmul %1, %2, %cst {dimension_numbers = #tpu.dot_dimension_numbers<[1], [0], [0], [1], [0, 0, 1, 1], [], []>} : vector<8x376xbf16>, vector<376x128xbf16>, vector<8x128xf32> -> vector<8x128xf32>
    %c0_3 = arith.constant 0 : index
    %c0_4 = arith.constant 0 : index
    %4 = vector.load %arg3[%c0_3, %c0_4] : memref<1x128xf32, #tpu.memory_space<vmem>>, vector<1x128xf32>
    %5 = vector.broadcast %4 : vector<1x128xf32> to vector<8x128xf32>
    %6 = arith.addf %3, %5 : vector<8x128xf32>
    %7 = math.tanh %6 : vector<8x128xf32>
    %8 = arith.truncf %7 : vector<8x128xf32> to vector<8x128xbf16>
    %c0_5 = arith.constant 0 : index
    %c0_6 = arith.constant 0 : index
    %9 = vector.load %arg4[%c0_5, %c0_6] : memref<128x128xbf16, #tpu.memory_space<vmem>>, vector<128x128xbf16>
    %cst_7 = arith.constant dense<0.000000e+00> : vector<8x128xf32>
    %10 = tpu.matmul %8, %9, %cst_7 {dimension_numbers = #tpu.dot_dimension_numbers<[1], [0], [0], [1], [0, 0, 1, 1], [], []>} : vector<8x128xbf16>, vector<128x128xbf16>, vector<8x128xf32> -> vector<8x128xf32>
    %c0_8 = arith.constant 0 : index
    %c0_9 = arith.constant 0 : index
    %11 = vector.load %arg5[%c0_8, %c0_9] : memref<1x128xf32, #tpu.memory_space<vmem>>, vector<1x128xf32>
    %12 = vector.broadcast %11 : vector<1x128xf32> to vector<8x128xf32>
    %13 = arith.addf %10, %12 : vector<8x128xf32>
    %14 = math.tanh %13 : vector<8x128xf32>
    %15 = arith.truncf %14 : vector<8x128xf32> to vector<8x128xbf16>
    %c0_10 = arith.constant 0 : index
    %c0_11 = arith.constant 0 : index
    %16 = vector.load %arg6[%c0_10, %c0_11] : memref<8x128xbf16, #tpu.memory_space<vmem>>, vector<8x128xbf16>
    tpu.vector_store %arg6[%c0_10, %c0_11], %15 {strides = array<i32>} : memref<8x128xbf16, #tpu.memory_space<vmem>>, vector<8x128xbf16>,
    return
  }
  func.func @transform_0(%arg0: i32) -> (i32, i32) {
    %c0_i32 = arith.constant 0 : i32
    %c0_i32_0 = arith.constant 0 : i32
    return %arg0, %c0_i32 : i32, i32
  }
  func.func @transform_1(%arg0: i32) -> (i32, i32) {
    %c0_i32 = arith.constant 0 : i32
    %c0_i32_0 = arith.constant 0 : i32
    %c0_i32_1 = arith.constant 0 : i32
    return %c0_i32, %c0_i32_0 : i32, i32
  }
  func.func @transform_2(%arg0: i32) -> (i32, i32) {
    %c0_i32 = arith.constant 0 : i32
    %c0_i32_0 = arith.constant 0 : i32
    %c0_i32_1 = arith.constant 0 : i32
    return %c0_i32, %c0_i32_0 : i32, i32
  }
  func.func @transform_3(%arg0: i32) -> (i32, i32) {
    %c0_i32 = arith.constant 0 : i32
    %c0_i32_0 = arith.constant 0 : i32
    %c0_i32_1 = arith.constant 0 : i32
    return %c0_i32, %c0_i32_0 : i32, i32
  }
  func.func @transform_4(%arg0: i32) -> (i32, i32) {
    %c0_i32 = arith.constant 0 : i32
    %c0_i32_0 = arith.constant 0 : i32
    %c0_i32_1 = arith.constant 0 : i32
    return %c0_i32, %c0_i32_0 : i32, i32
  }
  func.func @transform_5(%arg0: i32) -> (i32, i32) {
    %c0_i32 = arith.constant 0 : i32
    %c0_i32_0 = arith.constant 0 : i32
    return %arg0, %c0_i32 : i32, i32
  }
}

</mosaic_0001>

<bundles_post_ra>
// kernel: tpu_custom_call.1
= control target key start
LH: loop header
LB: loop body
LE: loop exit
PB: predicated region body
PF: predicated region fallthrough
CT: control target
= control target key end

     0   :  { %10 = vsyncpa [#allocation3], 0  ;;  %s853_s0 = inlined_call_operand.hbm [shape: f32[8,376], index: 0, kind: input, shape index: {}]   ;;  %s854_s1 = inlined_call_operand.hbm [shape: bf16[376,128], index: 1, kind: input, shape index: {}]   ;;  %s855_s2 = inlined_call_operand.vmem [shape: f32[1,128], index: 2, kind: input, shape index: {}]   ;;  %s856_s3 = inlined_call_operand.hbm [shape: bf16[128,128], index: 3, kind: input, shape index: {}]   ;;  %s857_s4 = inlined_call_operand.vmem [shape: f32[1,128], index: 4, kind: input, shape index: {}]   ;;  %s858_s5 = inlined_call_operand.hbm [shape: bf16[8,128], index: 5, kind: output, shape index: {}]  }
   0x1   :  { %11 = vsyncpa [#allocation6], 0 }
   0x2   :  { %12 = vsyncpa [#allocation4], 0  ;;  %s735_s18 = smov [#allocation5]   ;;  %s641_s22 = scalar_lea.hbm %s854_s1, 3008 }
   0x3   :  { %s28_s19 = sshll.u32 %s735_s18, 4  ;;  %p642_p0 = scmp.ne.s32.totalorder %s854_s1, %s641_s22  ;;  %s29_s19 = int_to_ptr.vmem [resolvable:$true] %s28_s19 }
   0x4   :  { %p645_p1 = scmp.lt.u32.totalorder %s641_s22, %s854_s1 }
   0x6   :  { %p647_p2 = pnand %p645_p1, %p642_p0 }
   0x8   :  { %650 = shalt.err (!%p647_p2)
}
   0x9   :  { %s651_s27 = scalar_lea.vmem %s29_s19, 3008  ;;  %p656_p4 = scmp.lt.s32.totalorder %s29_s19, %s29_s19 }
   0xa   :  { %p652_p3 = scmp.ne.s32.totalorder %s29_s19, %s651_s27  ;;  %p657_p5 = scmp.lt.s32.totalorder %s651_s27, %s651_s27 }
   0xc   :  { %p658_p6 = por %p657_p5, %p656_p4 }
   0xe   :  { %p659_p7 = pnand %p658_p6, %p652_p3 }
  0x10   :  { %662 = shalt.err (!%p659_p7)
}
  0x11   :  { %s736_s28 = smov 64   ;;  %s737_s29 = smov 4  }
  0x12   :  { %34 = dma.hbm_to_vmem [thread:$0]  %s854_s1, 3008, %s29_s19, [#allocation6], %s736_s28, %s736_s28, %s737_s29  }
  0x13   :  { %s738_s7 = smov [#allocation2]   ;;  %s739_s9 = smov [#allocation7]  }
  0x14   :  { %s19_s8 = sshll.u32 %s738_s7, 4  ;;  %s42_s10 = sshll.u32 %s739_s9, 4  ;;  %s20_s8 = int_to_ptr.vmem [resolvable:$true] %s19_s8  ;;  %s43_s10 = int_to_ptr.vmem [resolvable:$true] %s42_s10 }
  0x15   :  { %s663_s13 = scalar_lea.hbm %s853_s0, 384 }
  0x16   :  { %p664_p8 = scmp.ne.s32.totalorder %s853_s0, %s663_s13  ;;  %p667_p9 = scmp.lt.u32.totalorder %s663_s13, %s853_s0 }
  0x18   :  { %p669_p10 = pnand %p667_p9, %p664_p8 }
  0x1a   :  { %672 = shalt.err (!%p669_p10)
}
  0x1b   :  { %s673_s1 = scalar_lea.vmem %s20_s8, 384  ;;  %p678_p12 = scmp.lt.s32.totalorder %s20_s8, %s20_s8 }
  0x1c   :  { %p674_p11 = scmp.ne.s32.totalorder %s20_s8, %s673_s1  ;;  %p679_p13 = scmp.lt.s32.totalorder %s673_s1, %s673_s1 }
  0x1e   :  { %p680_p0 = por %p679_p13, %p678_p12 }
  0x20   :  { %p681_p1 = pnand %p680_p0, %p674_p11 }
  0x22   :  { %684 = shalt.err (!%p681_p1)
}
  0x23   :  { %22 = dma.hbm_to_vmem [thread:$0]  %s853_s0, 384, %s20_s8, [#allocation3]  }
  0x24   :  { %s685_s22 = scalar_lea.hbm %s856_s3, 1024 }
  0x25   :  { %p686_p2 = scmp.ne.s32.totalorder %s856_s3, %s685_s22  ;;  %p689_p3 = scmp.lt.u32.totalorder %s685_s22, %s856_s3 }
  0x27   :  { %p691_p4 = pnand %p689_p3, %p686_p2 }
  0x29   :  { %694 = shalt.err (!%p691_p4)
}
  0x2a   :  { %s695_s27 = scalar_lea.vmem %s43_s10, 1024  ;;  %p700_p6 = scmp.lt.s32.totalorder %s43_s10, %s43_s10 }
  0x2b   :  { %p696_p5 = scmp.ne.s32.totalorder %s43_s10, %s695_s27  ;;  %p701_p7 = scmp.lt.s32.totalorder %s695_s27, %s695_s27 }
  0x2d   :  { %p702_p8 = por %p701_p7, %p700_p6 }
  0x2f   :  { %p703_p9 = pnand %p702_p8, %p696_p5 }
  0x31   :  { %706 = shalt.err (!%p703_p9)
}
  0x32   :  { %48 = dma.hbm_to_vmem [thread:$0]  %s856_s3, 1024, %s43_s10, [#allocation6], %s736_s28, %s736_s28, %s737_s29  }
  0x33   :  { %729 = dma.done.wait [#allocation3], 384  }
  0x34   :  { %730 = vsyncadd [#allocation3], 4294966912 }
  0x35   :  { %731 = dma.done.wait [#allocation6], 4032  }
  0x36   :  { %732 = vsyncadd [#allocation6], 4294963264  ;;  %v740_v0 = vmov 0.0   ;;  %vm741_vm0 = vmmov 0   ;;  %v605_v1 = vld [vmem:[#allocation5 + $0x40] sm:$0xff]   ;;  %v608_v4 = vld [vmem:[#allocation5 + $0x48] sm:$0xff]  }
  0x37   :  { %557 = vmatprep.subr.bf16.mxu1 %v740_v0  ;;  %573 = vmatprep.mubr.msk.bf16.mxu1 %vm741_vm0, %v740_v0  ;;  %v606_v2 = vld [vmem:[#allocation5] sm:$0xff]   ;;  %v609_v5 = vld [vmem:[#allocation5 + $0x8] sm:$0xff]   ;;  %v611_v7 = vld [vmem:[#allocation5 + $0x50] sm:$0xff]   ;;  %vm266_vm1 = vcmask 1043456   ;;  %vm262_vm2 = vcmask 982016  }
  0x38   :  { %517 = vmatprep.subr.bf16.mxu0 %v605_v1  ;;  %v607_v3 = vld [vmem:[#allocation5 + $0x80] sm:$0xff]   ;;  %v610_v6 = vld [vmem:[#allocation5 + $0x88] sm:$0xff]   ;;  %v612_v8 = vld [vmem:[#allocation5 + $0x10] sm:$0xff]  }
  0x39   :  { %518 = vmatpush3.bf16.msra.mxu0 %v606_v2  ;;  %558 = vmatpush3.bf16.msra.mxu1 %v607_v3  ;;  %v613_v9 = vld [vmem:[#allocation5 + $0x90] sm:$0xff]   ;;  %v614_v10 = vld [vmem:[#allocation5 + $0x58] sm:$0xff]   ;;  %v617_v13 = vld [vmem:[#allocation5 + $0x60] sm:$0xff]  }
  0x3a   :  { %519 = vmatprep.subr.bf16.mxu0 %v608_v4  ;;  %559 = vmatprep.subr.bf16.mxu1 %v740_v0  ;;  %v615_v11 = vld [vmem:[#allocation5 + $0x18] sm:$0xff]   ;;  %v618_v14 = vld [vmem:[#allocation5 + $0x20] sm:$0xff]   ;;  %v620_v16 = vld [vmem:[#allocation5 + $0x68] sm:$0xff]  }
  0x3b   :  { %v616_v12 = vld [vmem:[#allocation5 + $0x98] sm:$0xff]   ;;  %v619_v15 = vld [vmem:[#allocation5 + $0xa0] sm:$0xff]   ;;  %v621_v17 = vld [vmem:[#allocation5 + $0x28] sm:$0xff]  }
  0x3c   :  { %v622_v18 = vld [vmem:[#allocation5 + $0xa8] sm:$0xff]   ;;  %v623_v19 = vld [vmem:[#allocation5 + $0x70] sm:$0xff]   ;;  %v628_v22 = vld [vmem:[#allocation5 + $0xb8] ss:$0 sps:$4 sm:$0xff]  }
  0x3d   :  { %520 = vmatpush3.bf16.msra.mxu0 %v609_v5  ;;  %560 = vmatpush3.bf16.msra.mxu1 %v610_v6  ;;  %v624_v20 = vld [vmem:[#allocation5 + $0x30] sm:$0xff]   ;;  %v626_v24 = vld [vmem:[#allocation5 + $0x78] sm:$0xff]   ;;  %v61_v27 = vld [vmem:[#allocation2] sm:$0xff]  ;;  %v268_v28 = vsel %vm266_vm1, %v628_v22, 0 }
  0x3e   :  { %521 = vmatprep.subr.bf16.mxu0 %v611_v7  ;;  %561 = vmatprep.subr.bf16.mxu1 %v740_v0  ;;  %v62_v21 = vld [vmem:[#allocation2 + $0x8] sm:$0xff]  ;;  %v627_v26 = vld [vmem:[#allocation5 + $0x38] sm:$0xff]   ;;  %v64_v30 = vpack.c.bf16 %v61_v27, %v61_v27  ;;  %v630_v33 = vld [vmem:[#allocation7 + $0x8] sm:$0xff]  }
  0x3f   :  { %v625_v23 = vld [vmem:[#allocation5 + $0xb0] sm:$0xff]   ;;  %v65_v25 = vpack.c.bf16 %v62_v21, %v62_v21  ;;  %v63_v29 = vld [vmem:[#allocation2 + $0x10] sm:$0xff]  ;;  %v634_v37 = vld [vmem:[#allocation7 + $0x28] sm:$0xff]  }
  0x40   :  { %v66_v31 = vpack.c.bf16 %v63_v29, %v63_v29  ;;  %v629_v32 = vld [vmem:[#allocation7] sm:$0xff]   ;;  %v631_v34 = vld [vmem:[#allocation7 + $0x10] sm:$0xff]   ;;  %v632_v35 = vld [vmem:[#allocation7 + $0x18] sm:$0xff]  }
  0x41   :  { %522 = vmatpush3.bf16.msra.mxu0 %v612_v8  ;;  %562 = vmatpush3.bf16.msra.mxu1 %v613_v9  ;;  %v633_v36 = vld [vmem:[#allocation7 + $0x20] sm:$0xff]   ;;  %v635_v38 = vld [vmem:[#allocation7 + $0x30] sm:$0xff]   ;;  %v636_v39 = vld [vmem:[#allocation7 + $0x38] sm:$0xff]  }
  0x42   :  { %523 = vmatprep.subr.bf16.mxu0 %v614_v10  ;;  %563 = vmatprep.subr.bf16.mxu1 %v740_v0  ;;  %v482_v42 = vld [vmem:[%s855_s2] ss:$0 sm:$0xff]  ;;  %s742_s2 = smov [#allocation8]  }
  0x43   :  { %302 = vmatprep.mubr.bf16.mxu0 %v65_v25  ;;  %v508_v54 = vld [vmem:[%s857_s4] ss:$0 sm:$0xff]  ;;  %s472_s7 = sshll.u32 %s742_s2, 4  ;;  %s473_s7 = int_to_ptr.vmem [resolvable:$true] %s472_s7 }
  0x44   :  { %s707_s8 = scalar_lea.vmem %s473_s7, 64  ;;  %p712_p11 = scmp.lt.s32.totalorder %s473_s7, %s473_s7 }
  0x45   :  { %524 = vmatpush3.bf16.msra.mxu0 %v615_v11  ;;  %564 = vmatpush3.bf16.msra.mxu1 %v616_v12  ;;  %p708_p10 = scmp.ne.s32.totalorder %s473_s7, %s707_s8  ;;  %p713_p12 = scmp.lt.s32.totalorder %s707_s8, %s707_s8 }
  0x46   :  { %525 = vmatprep.subr.bf16.mxu0 %v617_v13  ;;  %565 = vmatprep.subr.bf16.mxu1 %v740_v0 }
  0x47   :  { %p714_p13 = por %p713_p12, %p712_p11 }
  0x49   :  { %526 = vmatpush3.bf16.msra.mxu0 %v618_v14  ;;  %566 = vmatpush3.bf16.msra.mxu1 %v619_v15  ;;  %p715_p0 = pnand %p714_p13, %p708_p10 }
  0x4a   :  { %527 = vmatprep.subr.bf16.mxu0 %v620_v16  ;;  %567 = vmatprep.subr.bf16.mxu1 %v740_v0 }
  0x4d   :  { %528 = vmatpush3.bf16.msra.mxu0 %v621_v17  ;;  %568 = vmatpush3.bf16.msra.mxu1 %v622_v18 }
  0x4e   :  { %529 = vmatprep.subr.bf16.mxu0 %v623_v19  ;;  %569 = vmatprep.subr.bf16.mxu1 %v740_v0 }
  0x51   :  { %530 = vmatpush3.bf16.msra.mxu0 %v624_v20  ;;  %570 = vmatpush3.bf16.msra.mxu1 %v625_v23 }
  0x52   :  { %531 = vmatprep.subr.bf16.mxu0 %v626_v24  ;;  %571 = vmatprep.subr.bf16.mxu1 %v740_v0 }
  0x55   :  { %532 = vmatpush3.bf16.msra.mxu0 %v627_v26  ;;  %572 = vmatpush3.bf16.msra.mxu1 %v268_v28 }
  0x56   :  { %577 = vmatprep.subr.bf16.mxu0 %v740_v0 }
  0x58   :  { %303 = vmatmul.mubr.bf16.vlgmr.msra.gmra.mrb[0].mxu0 %v64_v30  ;;  %574 = vmatmul.mubr.msk.bf16.vlgmr.msra.gmra.mrb[0].mxu1 %vm262_vm2, %v66_v31 }
  0x59   :  { %578 = vmatpush3.bf16.msra.mxu0 %v629_v32  ;;  %593 = vmatprep.mubr.msk.bf16.mxu0 %vm741_vm0, %v740_v0 }
  0x5a   :  { %579 = vmatprep.subr.bf16.mxu0 %v740_v0 }
  0x5d   :  { %580 = vmatpush3.bf16.msra.mxu0 %v630_v33 }
  0x5e   :  { %581 = vmatprep.subr.bf16.mxu0 %v740_v0 }
  0x61   :  { %582 = vmatpush3.bf16.msra.mxu0 %v631_v34 }
  0x62   :  { %583 = vmatprep.subr.bf16.mxu0 %v740_v0 }
  0x65   :  { %584 = vmatpush3.bf16.msra.mxu0 %v632_v35 }
  0x66   :  { %585 = vmatprep.subr.bf16.mxu0 %v740_v0 }
  0x69   :  { %586 = vmatpush3.bf16.msra.mxu0 %v633_v36 }
  0x6a   :  { %587 = vmatprep.subr.bf16.mxu0 %v740_v0 }
  0x6d   :  { %588 = vmatpush3.bf16.msra.mxu0 %v634_v37 }
  0x6e   :  { %589 = vmatprep.subr.bf16.mxu0 %v740_v0 }
  0x71   :  { %590 = vmatpush3.bf16.msra.mxu0 %v635_v38 }
  0x72   :  { %591 = vmatprep.subr.bf16.mxu0 %v740_v0 }
  0x75   :  { %592 = vmatpush3.bf16.msra.mxu0 %v636_v39 }
 0x12b   :  { %v533_v40 = vpop.f32.mrb[0].mxu0  ;;  %v344_v43 = vpop.f32.mrb[0].mxu1 }
 0x12c   :  { %v534_v41 = vpop.f32.mrb[1].mxu0  ;;  %v575_v46 = vpop.f32.mrb[1].mxu1 }
 0x12d   :  { %v535_v44 = vadd.f32 %v534_v41, %v533_v40  ;;  %v536_v45 = vpop.f32.mrb[2].mxu0  ;;  %v347_v48 = vpop.f32.mrb[2].mxu1 }
 0x12e   :  { %v537_v47 = vpop.f32.mrb[3].mxu0  ;;  %v576_v50 = vpop.f32.mrb[3].mxu1 }
 0x12f   :  { %v305_v49 = vadd.f32 %v535_v44, %v482_v42 }
 0x131   :  { %v345_v51 = vadd.f32 %v344_v43, %v305_v49 }
 0x133   :  { %637 = vtanh.f32 %v345_v51 }
 0x13d   :  { %v638_v52 = vpop.eup %637 }
 0x13e   :  { %v351_v53 = vpack.c.bf16 %v638_v52, %v638_v52 }
 0x140   :  { %594 = vmatmul.mubr.bf16.vlgmr.msra.gmra.mrb[4].mxu0 %v351_v53 }
 0x213   :  { %v457_v55 = vpop.f32.mrb[4].mxu0 }
 0x214   :  { %v458_v56 = vadd.f32 %v508_v54, %v457_v55  ;;  %v595_v57 = vpop.f32.mrb[5].mxu0 }
 0x215   :  { %v460_v58 = vpop.f32.mrb[6].mxu0 }
 0x216   :  { %639 = vtanh.f32 %v458_v56  ;;  %v596_v59 = vpop.f32.mrb[7].mxu0 }
 0x220   :  { %v640_v60 = vpop.eup %639 }
 0x221   :  { %v464_v61 = vpack.c.bf16 %v640_v60, %v640_v60 }
 0x223   :  { %465 = vst [vmem:[#allocation8] sm:$0xf] %v464_v61 }
 0x224   :  { %718 = shalt.err (!%p715_p0)
}
 0x225   :  { %s719_s10 = scalar_lea.hbm %s858_s5, 64 }
 0x226   :  { %p720_p1 = scmp.ne.s32.totalorder %s858_s5, %s719_s10  ;;  %p723_p2 = scmp.lt.u32.totalorder %s719_s10, %s858_s5 }
 0x228   :  { %p725_p3 = pnand %p723_p2, %p720_p1 }
 0x22a   :  { %728 = shalt.err (!%p725_p3)
}
 0x22b   :  { %475 = dma.vmem_to_hbm [thread:$0]  %s473_s7, 64, %s858_s5, [#allocation4]  }
 0x22c   :  { %733 = dma.done.wait [#allocation4], 64  }
 0x22d   :  { %734 = vsyncadd [#allocation4], 4294967232 }
 0x22e   :  { %479 = vsyncpa [#allocation3], 1 }
 0x22f   :  { %480 = vsyncpa [#allocation6], 1 }
 0x230   :  { %481 = vsyncpa [#allocation4], 1 }

</bundles_post_ra>
